<compile_context>
chip_gen: v5e
topology: v5e:2x2
jax: 0.10.0
libtpu: 0.0.40
codegen_flags: <defaults>
</compile_context>

<pallas_src>
import math
import functools

import jax
import jax.numpy as jnp
from jax.experimental import pallas as pl
from jax.experimental.pallas import tpu as pltpu


# --------------------------------------------------------------------------
# helpers
# --------------------------------------------------------------------------

def _pick_tile(dim, target, align=1):
    """Largest tile <= target that divides `dim` (a multiple of `align`), else full dim."""
    if dim <= target:
        return dim
    t = (min(target, dim) // align) * align
    while t >= align:
        if dim % t == 0:
            return t
        t -= align
    return dim


# --------------------------------------------------------------------------
# Tiled matmul kernel: out = act(x @ W + b) + sum(extras)
# --------------------------------------------------------------------------

def _matmul_kernel(*refs, n_extra, activation):
    x_ref, w_ref, b_ref = refs[:3]
    extra_refs = refs[3:3 + n_extra]
    o_ref = refs[3 + n_extra]
    acc_ref = refs[4 + n_extra]

    k = pl.program_id(2)

    @pl.when(k == 0)
    def _():
        acc_ref[...] = jnp.zeros_like(acc_ref)

    acc_ref[...] += jnp.dot(
        x_ref[...].astype(jnp.bfloat16),      # activations -> bf16 for the MXU
        w_ref[...],                           # weights stored bf16
        preferred_element_type=jnp.float32,   # f32 accumulation
    )

    @pl.when(k == pl.num_programs(2) - 1)
    def _():
        out = acc_ref[...] + b_ref[...].astype(jnp.float32)   # bias only once (last K step)
        if activation == "gelu":
            c = math.sqrt(2.0 / math.pi)
            out = 0.5 * out * (1.0 + jnp.tanh(c * (out + 0.044715 * out * out * out)))
        for e in extra_refs:                   # fused residual / branch adds
            out = out + e[...]
        o_ref[...] = out.astype(o_ref.dtype)


def linear(x, w, b, *extras, activation=None, tm=256, tn=256, tk=512):
    """x: (M,K) f32, w: (K,N) bf16, b: (1,N) f32, extras: (M,N) f32 -> (M,N) f32."""
    M, K = x.shape
    N = w.shape[1]
    tm = _pick_tile(M, tm, 8)
    tn = _pick_tile(N, tn, 128)
    tk = _pick_tile(K, tk, 128)
    grid = (M // tm, N // tn, K // tk)

    in_specs = [
        pl.BlockSpec((tm, tk), lambda i, j, k: (i, k)),
        pl.BlockSpec((tk, tn), lambda i, j, k: (k, j)),
        pl.BlockSpec((1, tn), lambda i, j, k: (0, j)),
    ]
    in_specs += [pl.BlockSpec((tm, tn), lambda i, j, k: (i, j)) for _ in extras]

    return pl.pallas_call(
        functools.partial(_matmul_kernel, n_extra=len(extras), activation=activation),
        grid=grid,
        in_specs=in_specs,
        out_specs=pl.BlockSpec((tm, tn), lambda i, j, k: (i, j)),
        out_shape=jax.ShapeDtypeStruct((M, N), jnp.float32),
        scratch_shapes=[pltpu.VMEM((tm, tn), jnp.float32)],
        compiler_params=pltpu.CompilerParams(
            dimension_semantics=("parallel", "parallel", "arbitrary")),
    )(x, w, b, *extras)


# --------------------------------------------------------------------------
# Row-tiled LayerNorm
# --------------------------------------------------------------------------

def _layernorm_kernel(x_ref, g_ref, b_ref, o_ref, *, eps):
    x = x_ref[...]
    mean = jnp.mean(x, axis=-1, keepdims=True)
    var = jnp.mean(jnp.square(x - mean), axis=-1, keepdims=True)
    o_ref[...] = (x - mean) * jax.lax.rsqrt(var + eps) * g_ref[...] + b_ref[...]


def layernorm(x, g, b, eps, tm=256):
    M, D = x.shape
    tm = _pick_tile(M, tm, 8)
    return pl.pallas_call(
        functools.partial(_layernorm_kernel, eps=eps),
        grid=(M // tm,),
        in_specs=[
            pl.BlockSpec((tm, D), lambda i: (i, 0)),
            pl.BlockSpec((1, D), lambda i: (0, 0)),
            pl.BlockSpec((1, D), lambda i: (0, 0)),
        ],
        out_specs=pl.BlockSpec((tm, D), lambda i: (i, 0)),
        out_shape=jax.ShapeDtypeStruct((M, D), jnp.float32),
        compiler_params=pltpu.CompilerParams(dimension_semantics=("parallel",)),
    )(x, g, b)


# --------------------------------------------------------------------------
# Flash-style attention: online softmax, in-kernel causal mask
# --------------------------------------------------------------------------

def _flash_kernel(q_ref, k_ref, v_ref, o_ref, m_sc, l_sc, acc_sc, *, scale, tq, tkv):
    qi = pl.program_id(1)
    ki = pl.program_id(2)

    @pl.when(ki == 0)
    def _():
        m_sc[...] = jnp.full_like(m_sc, -jnp.inf)
        l_sc[...] = jnp.zeros_like(l_sc)
        acc_sc[...] = jnp.zeros_like(acc_sc)

    # skip kv tiles that are entirely above the causal diagonal
    @pl.when(ki * tkv <= qi * tq + (tq - 1))
    def _():
        q = (q_ref[...] * scale).astype(jnp.bfloat16)    # fold scale into q
        k = k_ref[...].astype(jnp.bfloat16)
        v = v_ref[...].astype(jnp.bfloat16)

        s = jnp.einsum("bqd,bkd->bqk", q, k,
                       preferred_element_type=jnp.float32)       # (hb, tq, tkv)
        q_pos = qi * tq + jax.lax.broadcasted_iota(jnp.int32, s.shape, 1)
        k_pos = ki * tkv + jax.lax.broadcasted_iota(jnp.int32, s.shape, 2)
        s = jnp.where(q_pos >= k_pos, s, -jnp.inf)               # causal mask, no HBM tensor

        m_prev = m_sc[...]
        m_new = jnp.maximum(m_prev, jnp.max(s, axis=-1, keepdims=True))
        alpha = jnp.exp(m_prev - m_new)
        p = jnp.exp(s - m_new)
        l_sc[...] = alpha * l_sc[...] + jnp.sum(p, axis=-1, keepdims=True)
        acc_sc[...] = alpha * acc_sc[...] + jnp.einsum(
            "bqk,bkd->bqd", p.astype(jnp.bfloat16), v,
            preferred_element_type=jnp.float32)
        m_sc[...] = m_new

    @pl.when(ki == pl.num_programs(2) - 1)
    def _():
        o_ref[...] = (acc_sc[...] *
                      pl.reciprocal(l_sc[...], approx=True)).astype(o_ref.dtype)


def flash_attention(q, k, v, scale, *, tq=128, tkv=128, hb=8):
    """q,k,v: (B*H, T, hd) f32 -> (B*H, T, hd) f32. Causal attention."""
    BH, T, hd = q.shape
    hb = _pick_tile(BH, hb, 1)      # several heads per grid step (bigger MXU tiles)
    tq = _pick_tile(T, tq, 8)
    tkv = _pick_tile(T, tkv, 8)
    grid = (BH // hb, T // tq, T // tkv)
    # TODO(synk): pack head_dim up to 128 lanes (or fold heads into the minor dim) for
    # fully lane-dense output stores when hd < 128.
    return pl.pallas_call(
        functools.partial(_flash_kernel, scale=scale, tq=tq, tkv=tkv),
        grid=grid,
        in_specs=[
            pl.BlockSpec((hb, tq, hd), lambda b, qi, ki: (b, qi, 0)),
            pl.BlockSpec((hb, tkv, hd), lambda b, qi, ki: (b, ki, 0)),
            pl.BlockSpec((hb, tkv, hd), lambda b, qi, ki: (b, ki, 0)),
        ],
        out_specs=pl.BlockSpec((hb, tq, hd), lambda b, qi, ki: (b, qi, 0)),
        out_shape=jax.ShapeDtypeStruct((BH, T, hd), jnp.float32),
        scratch_shapes=[
            pltpu.VMEM((hb, tq, 1), jnp.float32),   # m (running max)
            pltpu.VMEM((hb, tq, 1), jnp.float32),   # l (running denom)
            pltpu.VMEM((hb, tq, hd), jnp.float32),  # acc
        ],
        compiler_params=pltpu.CompilerParams(
            dimension_semantics=("parallel", "parallel", "arbitrary")),
    )(q, k, v)


# --------------------------------------------------------------------------
# RoPE (partial, non-traditional) — small elementwise glue in plain JAX
# TODO(synk): fuse RoPE into the attention kernel prologue (cos/sin as blocked inputs).
# --------------------------------------------------------------------------

def rope_apply(x, dims, base=10000.0):
    """x: (B*H, T, head_dim); rotate the first `dims` features (Phi partial RoPE)."""
    T = x.shape[-2]
    Dr = dims // 2
    positions = jnp.arange(0, T, dtype=jnp.float32)
    freqs = jnp.exp(-jnp.arange(0.0, Dr, dtype=jnp.float32) * (math.log(base) / Dr))
    theta = positions[:, None] * freqs[None, :]          # (T, Dr)
    cos, sin = jnp.cos(theta), jnp.sin(theta)
    x1 = x[..., :Dr]
    x2 = x[..., Dr:dims]
    rx1 = x1 * cos - x2 * sin
    rx2 = x1 * sin + x2 * cos
    return jnp.concatenate([rx1, rx2, x[..., dims:]], axis=-1)


# --------------------------------------------------------------------------
# Phi forward pass
# --------------------------------------------------------------------------

def phi_forward(params, tokens, cfg):
    B, T = tokens.shape
    D = cfg["d_model"]
    H = cfg["num_heads"]
    hd = D // H
    rope_dims = int(cfg["rotary_dim"] * hd)
    eps = cfg["eps"]
    M = B * T
    scale = math.sqrt(1.0 / hd)

    x = params["wte"][tokens]                            # (B, T, D) embedding gather

    for lp in params["layers"]:
        x2d = x.reshape(M, D)                            # residual
        h2d = layernorm(x2d, lp["ln_g"], lp["ln_b"], eps)

        # ---- PhiMHA: fused QKV projection (one (D,3D) matmul) ----
        qkv = linear(h2d, lp["wqkv"], lp["bqkv"])        # (M, 3D)
        qkv = qkv.reshape(B, T, 3, H, hd).transpose(2, 0, 3, 1, 4)   # (3,B,H,T,hd)
        # TODO(synk): express (B,H) layout via BlockSpec index_map to drop these relayouts.
        q = qkv[0].reshape(B * H, T, hd)
        k = qkv[1].reshape(B * H, T, hd)
        v = qkv[2].reshape(B * H, T, hd)

        q = rope_apply(q, rope_dims)
        k = rope_apply(k, rope_dims)

        attn = flash_attention(q, k, v, scale)           # (B*H, T, hd)
        attn2d = attn.reshape(B, H, T, hd).transpose(0, 2, 1, 3).reshape(M, D)
        dense_out = linear(attn2d, lp["wd"], lp["bd"])   # (M, D)

        # ---- MLP: fc1 + gelu (fused) then fc2 with fused attn-out + residual adds ----
        h1 = linear(h2d, lp["w1"], lp["b1"], activation="gelu")      # (M, HID)
        x = linear(h1, lp["w2"], lp["b2"], dense_out, x2d).reshape(B, T, D)

    x2d = layernorm(x.reshape(M, D), params["lnf_g"], params["lnf_b"], eps)
    logits = linear(x2d, params["w_lm"], params["b_lm"])
    return logits.reshape(B, T, cfg["vocab_size"])


# --------------------------------------------------------------------------
# Deterministic parameter init (synthetic; shapes follow Phi.__init__)
# --------------------------------------------------------------------------

def init_params(key, cfg):
    D = cfg["d_model"]
    V = cfg["vocab_size"]
    HID = cfg["multiple_of"] * D

    def w(key, shape, scale=0.02):
        return (scale * jax.random.normal(key, shape)).astype(jnp.bfloat16)

    def bias(key, shape, scale=0.02):
        return (scale * jax.random.normal(key, shape)).astype(jnp.float32)

    keys = iter(jax.random.split(key, 4 + 8 * cfg["num_layers"]))

    params = {
        "wte": (0.02 * jax.random.normal(next(keys), (V, D))).astype(jnp.float32),
        "lnf_g": jnp.ones((1, D), jnp.float32),
        "lnf_b": jnp.zeros((1, D), jnp.float32),
        "w_lm": w(next(keys), (D, V)),
        "b_lm": jnp.zeros((1, V), jnp.float32),
        "layers": [],
    }
    for _ in range(cfg["num_layers"]):
        lp = {
            "ln_g": jnp.ones((1, D), jnp.float32),
            "ln_b": jnp.zeros((1, D), jnp.float32),
            "wqkv": w(next(keys), (D, 3 * D)), "bqkv": bias(next(keys), (1, 3 * D)),
            "wd": w(next(keys), (D, D)), "bd": bias(next(keys), (1, D)),
            "w1": w(next(keys), (D, HID)), "b1": bias(next(keys), (1, HID)),
            "w2": w(next(keys), (HID, D)), "b2": bias(next(keys), (1, D)),
        }
        params["layers"].append(lp)
    return params


# --------------------------------------------------------------------------
# Main
# --------------------------------------------------------------------------

if __name__ == "__main__":
    cfg = dict(
        vocab_size=64,
        seq_len=8,
        d_model=64,
        num_heads=4,      # head_dim = 16, rotary dims = int(0.4*16) = 6
        num_layers=2,
        multiple_of=4,
        eps=1e-5,
        rotary_dim=0.4,
    )

    key = jax.random.PRNGKey(0)
    kp, kt = jax.random.split(key)
    params = init_params(kp, cfg)

    B, T = 2, cfg["seq_len"]
    tokens = jax.random.randint(kt, (B, T), 0, cfg["vocab_size"], dtype=jnp.int32)

    logits = phi_forward(params, tokens, cfg)
    jax.block_until_ready(logits)

    assert logits.shape == (B, T, cfg["vocab_size"])
    assert logits.dtype == jnp.float32
    assert bool(jnp.all(jnp.isfinite(logits)))
    print("KERNEL_OK")
</pallas_src>

<mosaic_0001>
module attributes {stable_mosaic.version = 11 : i64} {
  func.func @_layernorm_kernel(%arg0: i32, %arg1: memref<16x64xf32, #tpu.memory_space<vmem>>, %arg2: memref<1x64xf32, #tpu.memory_space<vmem>>, %arg3: memref<1x64xf32, #tpu.memory_space<vmem>>, %arg4: memref<16x64xf32, #tpu.memory_space<vmem>>) attributes {dimension_semantics = [#tpu.dimension_semantics<parallel>], iteration_bounds = array<i64: 1>, scalar_prefetch = 0 : i64, scratch_operands = 0 : i64, tpu.core_type = #tpu.core_type<tc>, window_params = [{transform_indices = @transform_0, window_bounds = array<i64: 16, 64>}, {pipeline_mode = #tpu.pipeline_mode<synchronous>, transform_indices = @transform_1, window_bounds = array<i64: 1, 64>}, {pipeline_mode = #tpu.pipeline_mode<synchronous>, transform_indices = @transform_2, window_bounds = array<i64: 1, 64>}, {transform_indices = @transform_3, window_bounds = array<i64: 16, 64>}]} {
    %c0 = arith.constant 0 : index
    %c0_0 = arith.constant 0 : index
    %0 = vector.load %arg1[%c0, %c0_0] : memref<16x64xf32, #tpu.memory_space<vmem>>, vector<16x64xf32>
    %cst = arith.constant dense<0.000000e+00> : vector<16xf32>
    %1 = vector.multi_reduction <add>, %0, %cst [1] : vector<16x64xf32> to vector<16xf32>
    %2 = vector.shape_cast %1 : vector<16xf32> to vector<16x1xf32>
    %cst_1 = arith.constant 6.400000e+01 : f32
    %3 = vector.broadcast %cst_1 : f32 to vector<16x1xf32>
    %4 = arith.divf %2, %3 : vector<16x1xf32>
    %5 = vector.broadcast %4 : vector<16x1xf32> to vector<16x64xf32>
    %6 = arith.subf %0, %5 : vector<16x64xf32>
    %7 = arith.mulf %6, %6 : vector<16x64xf32>
    %cst_2 = arith.constant dense<0.000000e+00> : vector<16xf32>
    %8 = vector.multi_reduction <add>, %7, %cst_2 [1] : vector<16x64xf32> to vector<16xf32>
    %9 = vector.shape_cast %8 : vector<16xf32> to vector<16x1xf32>
    %cst_3 = arith.constant 6.400000e+01 : f32
    %10 = vector.broadcast %cst_3 : f32 to vector<16x1xf32>
    %11 = arith.divf %9, %10 : vector<16x1xf32>
    %12 = vector.broadcast %4 : vector<16x1xf32> to vector<16x64xf32>
    %13 = arith.subf %0, %12 : vector<16x64xf32>
    %cst_4 = arith.constant 9.99999974E-6 : f32
    %14 = vector.broadcast %cst_4 : f32 to vector<16x1xf32>
    %15 = arith.addf %11, %14 : vector<16x1xf32>
    %16 = math.rsqrt %15 : vector<16x1xf32>
    %17 = vector.broadcast %16 : vector<16x1xf32> to vector<16x64xf32>
    %18 = arith.mulf %13, %17 : vector<16x64xf32>
    %c0_5 = arith.constant 0 : index
    %c0_6 = arith.constant 0 : index
    %19 = vector.load %arg2[%c0_5, %c0_6] : memref<1x64xf32, #tpu.memory_space<vmem>>, vector<1x64xf32>
    %20 = vector.broadcast %19 : vector<1x64xf32> to vector<16x64xf32>
    %21 = arith.mulf %18, %20 : vector<16x64xf32>
    %c0_7 = arith.constant 0 : index
    %c0_8 = arith.constant 0 : index
    %22 = vector.load %arg3[%c0_7, %c0_8] : memref<1x64xf32, #tpu.memory_space<vmem>>, vector<1x64xf32>
    %23 = vector.broadcast %22 : vector<1x64xf32> to vector<16x64xf32>
    %24 = arith.addf %21, %23 : vector<16x64xf32>
    %c0_9 = arith.constant 0 : index
    %c0_10 = arith.constant 0 : index
    %25 = vector.load %arg4[%c0_9, %c0_10] : memref<16x64xf32, #tpu.memory_space<vmem>>, vector<16x64xf32>
    tpu.vector_store %arg4[%c0_9, %c0_10], %24 {strides = array<i32>} : memref<16x64xf32, #tpu.memory_space<vmem>>, vector<16x64xf32>,
    return
  }
  func.func @transform_0(%arg0: i32) -> (i32, i32) {
    %c0_i32 = arith.constant 0 : i32
    %c0_i32_0 = arith.constant 0 : i32
    return %arg0, %c0_i32 : i32, i32
  }
  func.func @transform_1(%arg0: i32) -> (i32, i32) {
    %c0_i32 = arith.constant 0 : i32
    %c0_i32_0 = arith.constant 0 : i32
    %c0_i32_1 = arith.constant 0 : i32
    return %c0_i32, %c0_i32_0 : i32, i32
  }
  func.func @transform_2(%arg0: i32) -> (i32, i32) {
    %c0_i32 = arith.constant 0 : i32
    %c0_i32_0 = arith.constant 0 : i32
    %c0_i32_1 = arith.constant 0 : i32
    return %c0_i32, %c0_i32_0 : i32, i32
  }
  func.func @transform_3(%arg0: i32) -> (i32, i32) {
    %c0_i32 = arith.constant 0 : i32
    %c0_i32_0 = arith.constant 0 : i32
    return %arg0, %c0_i32 : i32, i32
  }
}

</mosaic_0001>

<bundles_post_ra>
// kernel: tpu_custom_call.1
= control target key start
LH: loop header
LB: loop body
LE: loop exit
PB: predicated region body
PF: predicated region fallthrough
CT: control target
= control target key end

     0   :  { %8 = vsyncpa [#allocation3], 0  ;;  %s275_s0 = inlined_call_operand.hbm [shape: f32[16,64], index: 0, kind: input, shape index: {}]   ;;  %s276_s1 = inlined_call_operand.hbm [shape: f32[1,64], index: 1, kind: input, shape index: {}]   ;;  %s277_s2 = inlined_call_operand.vmem [shape: f32[1,64], index: 2, kind: input, shape index: {}]   ;;  %s278_s3 = inlined_call_operand.hbm [shape: f32[16,64], index: 3, kind: output, shape index: {}]  }
   0x1   :  { %9 = vsyncpa [#allocation6], 0 }
   0x2   :  { %10 = vsyncpa [#allocation4], 0  ;;  %s15_s14 = sshll.u32 %s275_s0, 4  ;;  %s225_s15 = smov [#allocation2]   ;;  %s16_s14 = int_to_ptr.hbm [resolvable:$true] %s15_s14 }
   0x3   :  { %s17_s16 = sshll.u32 %s225_s15, 4  ;;  %s29_s19 = sshll.u32 %s276_s1, 4  ;;  %s18_s16 = int_to_ptr.vmem [resolvable:$true] %s17_s16  ;;  %s30_s19 = int_to_ptr.hbm [resolvable:$true] %s29_s19 }
   0x4   :  { %s226_s20 = smov 128   ;;  %s227_s21 = smov 8  }
   0x5   :  { %23 = dma.hbm_to_vmem [thread:$0]  %s16_s14, 256, %s18_s16, [#allocation3], %s226_s20, %s226_s20, %s227_s21  }
   0x6   :  { %s228_s22 = smov [#allocation5]  }
   0x7   :  { %s31_s23 = sshll.u32 %s228_s22, 4  ;;  %s32_s23 = int_to_ptr.vmem [resolvable:$true] %s31_s23 }
   0x8   :  { %34 = dma.hbm_to_vmem [thread:$0]  %s30_s19, 16, %s32_s23, [#allocation6]  }
   0x9   :  { %219 = dma.done.wait [#allocation3], 256  }
   0xa   :  { %220 = vsyncadd [#allocation3], 4294967040 }
   0xb   :  { %221 = dma.done.wait [#allocation6], 16  }
   0xc   :  { %222 = vsyncadd [#allocation6], 4294967280  ;;  %vm47_vm0 = vcmask 523264   ;;  %v45_v0 = vld [vmem:[#allocation2] sm:$0xff]  ;;  %v46_v2 = vld [vmem:[#allocation2 + $0x8] sm:$0xff]  ;;  %v229_v4 = vmov 64.0  }
   0xd   :  { %v48_v1 = vsel %vm47_vm0, %v45_v0, 0.0  ;;  %v51_v3 = vsel %vm47_vm0, %v46_v2, 0.0  ;;  %141 = vrcp.f32 %v229_v4  ;;  %v139_v35 = vld [vmem:[#allocation5] ss:$0 sm:$0xff]  ;;  %v140_v39 = vld [vmem:[%s277_s2] ss:$0 sm:$0xff] }
   0xe   :  { %49 = vadd.xlane.f32.xlu0 %v48_v1  ;;  %s230_s24 = smov [#allocation7]   ;;  %s119_s28 = sshll.u32 %s278_s3, 4  ;;  %s120_s28 = int_to_ptr.hbm [resolvable:$true] %s119_s28 }
   0xf   :  { %s117_s25 = sshll.u32 %s230_s24, 4  ;;  %s118_s25 = int_to_ptr.vmem [resolvable:$true] %s117_s25 }
  0x13   :  { %v142_v5 = vpop.eup %141 }
  0x14   :  { %v55_v6 = vmul.f32 64.0, %v142_v5  ;;  %vm59_vm1 = vweird.f32 %v142_v5 }
  0x16   :  { %52 = vadd.xlane.f32.xlu0 %v51_v3  ;;  %v56_v7 = vsub.f32 1.0, %v55_v6 }
  0x18   :  { %v57_v8 = vmul.f32 %v142_v5, %v56_v7 }
  0x1a   :  { %v58_v9 = vadd.f32 %v142_v5, %v57_v8 }
  0x1c   :  { %v60_v10 = vsel %vm59_vm1, %v142_v5, %v58_v9 }
  0x81   :  { %v50_v11 = vpop.xlane.xlu0 %49 }
  0x82   :  { %v61_v12 = vmul.f32 %v60_v10, %v50_v11 }
  0x84   :  { %v63_v13 = vsub.f32 %v45_v0, %v61_v12 }
  0x86   :  { %v65_v14 = vmul.f32 %v63_v13, %v63_v13 }
  0x88   :  { %v67_v15 = vsel %vm47_vm0, %v65_v14, 0.0 }
  0x89   :  { %68 = vadd.xlane.f32.xlu1 %v67_v15  ;;  %v53_v16 = vpop.xlane.xlu0 %52 }
  0x8a   :  { %v62_v17 = vmul.f32 %v60_v10, %v53_v16 }
  0x8c   :  { %v64_v18 = vsub.f32 %v46_v2, %v62_v17 }
  0x8e   :  { %v66_v19 = vmul.f32 %v64_v18, %v64_v18 }
  0x90   :  { %v70_v20 = vsel %vm47_vm0, %v66_v19, 0.0 }
  0x91   :  { %71 = vadd.xlane.f32.xlu1 %v70_v20 }
  0xfc   :  { %v69_v21 = vpop.xlane.xlu1 %68 }
  0xfd   :  { %v73_v22 = vmul.f32 %v69_v21, %v60_v10 }
  0xff   :  { %v75_v23 = vadd.f32 1e-05, %v73_v22 }
 0x101   :  { %143 = vrsqrt.f32 %v75_v23  ;;  %vm83_vm3 = vweird.f32 %v75_v23 }
 0x104   :  { %v72_v24 = vpop.xlane.xlu1 %71 }
 0x105   :  { %v74_v25 = vmul.f32 %v72_v24, %v60_v10 }
 0x107   :  { %v144_v26 = vpop.eup %143  ;;  %v76_v27 = vadd.f32 1e-05, %v74_v25 }
 0x108   :  { %v78_v28 = vmul.f32 %v144_v26, %v75_v23  ;;  %vm84_vm2 = vweird.f32 %v144_v26 }
 0x109   :  { %145 = vrsqrt.f32 %v76_v27  ;;  %vm85_vm4 = vmor %vm83_vm3, %vm84_vm2  ;;  %vm93_vm6 = vweird.f32 %v76_v27 }
 0x10a   :  { %v79_v29 = vmul.f32 %v144_v26, %v78_v28 }
 0x10c   :  { %v80_v30 = vmul.f32 0.5, %v79_v29 }
 0x10e   :  { %v81_v31 = vsub.f32 1.5, %v80_v30 }
 0x10f   :  { %v146_v32 = vpop.eup %145 }
 0x110   :  { %v82_v33 = vmul.f32 %v144_v26, %v81_v31  ;;  %v88_v34 = vmul.f32 %v146_v32, %v76_v27  ;;  %vm94_vm5 = vweird.f32 %v146_v32 }
 0x111   :  { %vm95_vm7 = vmor %vm93_vm6, %vm94_vm5 }
 0x112   :  { %v86_v36 = vsel %vm85_vm4, %v144_v26, %v82_v33  ;;  %v89_v37 = vmul.f32 %v146_v32, %v88_v34 }
 0x113   :  { %v97_v38 = vmul.f32 %v86_v36, %v63_v13 }
 0x114   :  { %v90_v40 = vmul.f32 0.5, %v89_v37 }
 0x115   :  { %v103_v41 = vmul.f32 %v139_v35, %v97_v38 }
 0x116   :  { %v91_v42 = vsub.f32 1.5, %v90_v40 }
 0x117   :  { %v109_v43 = vadd.f32 %v140_v39, %v103_v41 }
 0x118   :  { %v92_v44 = vmul.f32 %v146_v32, %v91_v42 }
 0x119   :  { %111 = vst.msk [vmem:[#allocation7] sm:$0xff] %vm47_vm0, %v109_v43 }
 0x11a   :  { %v96_v45 = vsel %vm95_vm7, %v146_v32, %v92_v44 }
 0x11b   :  { %v98_v46 = vmul.f32 %v96_v45, %v64_v18 }
 0x11d   :  { %v104_v47 = vmul.f32 %v139_v35, %v98_v46 }
 0x11f   :  { %v110_v48 = vadd.f32 %v140_v39, %v104_v47 }
 0x121   :  { %112 = vst.msk [vmem:[#allocation7 + $0x8] sm:$0xff] %vm47_vm0, %v110_v48 }
 0x122   :  { %125 = dma.vmem_to_hbm [thread:$0]  %s118_s25, 256, %s120_s28, [#allocation4], %s226_s20, %s226_s20, %s227_s21  }
 0x123   :  { %223 = dma.done.wait [#allocation4], 256  }
 0x124   :  { %224 = vsyncadd [#allocation4], 4294967040 }
 0x125   :  { %130 = vsyncpa [#allocation3], 1 }
 0x126   :  { %131 = vsyncpa [#allocation6], 1 }
 0x127   :  { %132 = vsyncpa [#allocation4], 1 }

</bundles_post_ra>
